<compile_context>
chip_gen: v7x
topology: tpu7x:2x2x1
jax: 0.10.0
libtpu: 0.0.40
codegen_flags: <defaults>
</compile_context>

<pallas_src>
import functools

import jax
import jax.numpy as jnp
from jax.experimental import pallas as pl
from jax.experimental.pallas import tpu as pltpu


def centrality_kernel(idx_ref, tab_ref, o_ref, *, max_degrees):
    # idx_ref: (2, TILE_M) int32  -- row 0 = in-degrees, row 1 = out-degrees
    # tab_ref: (D_pad, 2*V_pad) f32 -- [:, :V] = in_table.T, [:, V_pad:V_pad+V] = out_table.T
    # o_ref:   (D_pad, TILE_M) f32
    two_v = tab_ref.shape[1]
    v_pad = two_v // 2
    tile_m = idx_ref.shape[1]

    idx = jnp.clip(idx_ref[...], 0, max_degrees)          # (2, TILE_M)
    idx_in = idx[0:1, :]                                   # (1, TILE_M)
    idx_out = idx[1:2, :] + v_pad                          # (1, TILE_M), offset into 2nd table half

    # Combined one-hot selector, transposed: onehot_T[c, m] = 1 iff column m
    # selects fused-table row c.  The in/out halves are disjoint, so a single
    # logical_or gives both contributions; the MXU matmul then sums them.
    iota = jax.lax.broadcasted_iota(jnp.int32, (two_v, tile_m), 0)
    onehot_t = jnp.logical_or(iota == idx_in, iota == idx_out).astype(jnp.float32)

    # Single K=2*V_pad matmul; output is lane-dense along TILE_M.
    o_ref[...] = jnp.dot(tab_ref[...], onehot_t,
                         preferred_element_type=jnp.float32).astype(o_ref.dtype)


def centrality_encoder(in_degrees, out_degrees, in_table, out_table,
                       max_degrees, tile_m_max=512):
    """in_degrees/out_degrees: (B, N) int; tables: (max_degrees+1, D) f32."""
    B, N = in_degrees.shape
    M = B * N
    V, D = in_table.shape

    # Pad vocab to a lane-friendly 128 multiple (extra columns are zero and
    # never selected because indices are clamped to <= max_degrees < V);
    # pad D to a sublane-friendly 8 multiple (extra rows are zero, sliced off).
    v_pad = ((V + 127) // 128) * 128
    d_pad = ((D + 7) // 8) * 8

    # Fused + transposed embedding table: (D_pad, 2*V_pad).
    tab_t = jnp.zeros((d_pad, 2 * v_pad), jnp.float32)
    tab_t = tab_t.at[:D, :V].set(in_table.T.astype(jnp.float32))
    tab_t = tab_t.at[:D, v_pad:v_pad + V].set(out_table.T.astype(jnp.float32))

    # Tile over the flattened node axis M (lane dim): multiple of 128, big by
    # default, capped to the (padded) problem size so small inputs still work.
    tile_m = min(tile_m_max, ((M + 127) // 128) * 128)
    m_pad = ((M + tile_m - 1) // tile_m) * tile_m
    grid = (m_pad // tile_m,)

    # Single merged index array: one DMA per grid step instead of two.
    idx = jnp.zeros((2, m_pad), jnp.int32)
    idx = idx.at[0, :M].set(in_degrees.reshape(M).astype(jnp.int32))
    idx = idx.at[1, :M].set(out_degrees.reshape(M).astype(jnp.int32))

    kernel = functools.partial(centrality_kernel, max_degrees=max_degrees)
    out_t = pl.pallas_call(
        kernel,
        out_shape=jax.ShapeDtypeStruct((d_pad, m_pad), jnp.float32),
        grid_spec=pltpu.PrefetchScalarGridSpec(
            num_scalar_prefetch=0,
            grid=grid,
            in_specs=[
                # (2, TILE_M) index slab, advances along the lane/M axis.
                pl.BlockSpec((2, tile_m), lambda i: (0, i)),
                # Fused transposed table, resident across all grid steps.
                # (pipeline_mode single-buffering would save a copy at large D;
                #  negligible at small D, left at the default for portability.)
                pl.BlockSpec((d_pad, 2 * v_pad), lambda i: (0, 0)),
            ],
            out_specs=pl.BlockSpec((d_pad, tile_m), lambda i: (0, i)),
        ),
        compiler_params=pltpu.CompilerParams(
            dimension_semantics=("parallel",),   # lets v7x shard steps over its 2 TCs
            vmem_limit_bytes=32 * 1024 * 1024,   # explicit, plenty of headroom on 64 MiB v7x
        ),
    )(idx, tab_t)

    # Layout plumbing back to the module's (B, N, D) output.
    return out_t[:D, :M].T.reshape(B, N, D)


def _reference(in_degrees, out_degrees, in_table, out_table, max_degrees):
    i = jnp.clip(in_degrees, 0, max_degrees)
    o = jnp.clip(out_degrees, 0, max_degrees)
    return in_table[i] + out_table[o]


if __name__ == "__main__":
    # cfg: max_degrees=16, d_model=32; batch=2, seq(nodes)=8
    max_degrees = 16
    d_model = 32
    B, N = 2, 8
    V = max_degrees + 1

    key = jax.random.PRNGKey(0)
    k1, k2, k3, k4 = jax.random.split(key, 4)

    # nn.Embedding init: N(0,1) with padding row (index 0) zeroed.
    in_table = jax.random.normal(k1, (V, d_model), jnp.float32)
    in_table = in_table.at[0].set(0.0)
    out_table = jax.random.normal(k2, (V, d_model), jnp.float32)
    out_table = out_table.at[0].set(0.0)

    # Degrees include out-of-range values to exercise clamping.
    in_degrees = jax.random.randint(k3, (B, N), -2, max_degrees + 5, jnp.int32)
    out_degrees = jax.random.randint(k4, (B, N), -2, max_degrees + 5, jnp.int32)

    z = centrality_encoder(in_degrees, out_degrees, in_table, out_table,
                           max_degrees)
    z = jax.block_until_ready(z)

    z_ref = _reference(in_degrees, out_degrees, in_table, out_table,
                       max_degrees)
    assert z.shape == (B, N, d_model)
    assert jnp.allclose(z, z_ref, atol=1e-5, rtol=1e-5)

    print("KERNEL_OK")
</pallas_src>

<mosaic_0001>
module attributes {stable_mosaic.version = 11 : i64} {
  func.func @centrality_kernel(%arg0: i32, %arg1: memref<2x128xi32, #tpu.memory_space<vmem>>, %arg2: memref<32x256xf32, #tpu.memory_space<vmem>>, %arg3: memref<32x128xf32, #tpu.memory_space<vmem>>) attributes {dimension_semantics = [#tpu.dimension_semantics<parallel>], iteration_bounds = array<i64: 1>, scalar_prefetch = 0 : i64, scratch_operands = 0 : i64, tpu.core_type = #tpu.core_type<tc>, window_params = [{transform_indices = @transform_0, window_bounds = array<i64: 2, 128>}, {pipeline_mode = #tpu.pipeline_mode<synchronous>, transform_indices = @transform_1, window_bounds = array<i64: 32, 256>}, {transform_indices = @transform_2, window_bounds = array<i64: 32, 128>}]} {
    %c0 = arith.constant 0 : index
    %c0_0 = arith.constant 0 : index
    %0 = vector.load %arg1[%c0, %c0_0] : memref<2x128xi32, #tpu.memory_space<vmem>>, vector<2x128xi32>
    %c0_i32 = arith.constant 0 : i32
    %c16_i32 = arith.constant 16 : i32
    %1 = vector.broadcast %c0_i32 : i32 to vector<2x128xi32>
    %2 = arith.maxsi %1, %0 : vector<2x128xi32>
    %3 = vector.broadcast %c16_i32 : i32 to vector<2x128xi32>
    %4 = arith.minsi %3, %2 : vector<2x128xi32>
    %5 = vector.extract_strided_slice %4 {offsets = [0, 0], sizes = [1, 128], strides = [1, 1]} : vector<2x128xi32> to vector<1x128xi32>
    %6 = vector.extract_strided_slice %4 {offsets = [1, 0], sizes = [1, 128], strides = [1, 1]} : vector<2x128xi32> to vector<1x128xi32>
    %c128_i32 = arith.constant 128 : i32
    %7 = vector.broadcast %c128_i32 : i32 to vector<1x128xi32>
    %8 = arith.addi %6, %7 : vector<1x128xi32>
    %9 = tpu.iota {dimensions = array<i32: 0>} : vector<256x128xi32>
    %10 = vector.broadcast %5 : vector<1x128xi32> to vector<256x128xi32>
    %11 = arith.cmpi eq, %9, %10 : vector<256x128xi32>
    %12 = vector.broadcast %8 : vector<1x128xi32> to vector<256x128xi32>
    %13 = arith.cmpi eq, %9, %12 : vector<256x128xi32>
    %14 = arith.ori %11, %13 : vector<256x128xi1>
    %15 = arith.extui %14 : vector<256x128xi1> to vector<256x128xi32>
    %16 = arith.sitofp %15 : vector<256x128xi32> to vector<256x128xf32>
    %c0_1 = arith.constant 0 : index
    %c0_2 = arith.constant 0 : index
    %17 = vector.load %arg2[%c0_1, %c0_2] : memref<32x256xf32, #tpu.memory_space<vmem>>, vector<32x256xf32>
    %cst = arith.constant dense<0.000000e+00> : vector<32x128xf32>
    %18 = tpu.matmul %17, %16, %cst {dimension_numbers = #tpu.dot_dimension_numbers<[1], [0], [0], [1], [0, 0, 1, 1], [], []>} : vector<32x256xf32>, vector<256x128xf32>, vector<32x128xf32> -> vector<32x128xf32>
    %c0_3 = arith.constant 0 : index
    %c0_4 = arith.constant 0 : index
    %19 = vector.load %arg3[%c0_3, %c0_4] : memref<32x128xf32, #tpu.memory_space<vmem>>, vector<32x128xf32>
    tpu.vector_store %arg3[%c0_3, %c0_4], %18 {strides = array<i32>} : memref<32x128xf32, #tpu.memory_space<vmem>>, vector<32x128xf32>,
    return
  }
  func.func @transform_0(%arg0: i32) -> (i32, i32) {
    %c0_i32 = arith.constant 0 : i32
    %c0_i32_0 = arith.constant 0 : i32
    return %c0_i32, %arg0 : i32, i32
  }
  func.func @transform_1(%arg0: i32) -> (i32, i32) {
    %c0_i32 = arith.constant 0 : i32
    %c0_i32_0 = arith.constant 0 : i32
    %c0_i32_1 = arith.constant 0 : i32
    return %c0_i32, %c0_i32_0 : i32, i32
  }
  func.func @transform_2(%arg0: i32) -> (i32, i32) {
    %c0_i32 = arith.constant 0 : i32
    %c0_i32_0 = arith.constant 0 : i32
    return %c0_i32, %arg0 : i32, i32
  }
}

</mosaic_0001>

<bundles_post_ra>
// kernel: tpu_custom_call.1
= control target key start
LH: loop header
LB: loop body
LE: loop exit
PB: predicated region body
PF: predicated region fallthrough
CT: control target
= control target key end

     0   :  { %7 = vsyncpa [#allocation3], 0  ;;  %s799_s0 = inlined_call_operand.hbm [shape: s32[2,128], index: 0, kind: input, shape index: {}]   ;;  %s800_s1 = inlined_call_operand.hbm [shape: f32[32,256], index: 1, kind: input, shape index: {}]   ;;  %s801_s2 = inlined_call_operand.hbm [shape: f32[32,128], index: 2, kind: output, shape index: {}]  }
   0x1   :  { %8 = vsyncpa [#allocation6], 0 }
   0x2   :  { %9 = vsyncpa [#allocation4], 0  ;;  %s596_s9 = smov [#allocation2]   ;;  %s597_s11 = smov [#allocation5]  }
   0x3   :  { %s16_s10 = sshll.u32 %s596_s9, 4  ;;  %s25_s12 = sshll.u32 %s597_s11, 4  ;;  %s17_s10 = int_to_ptr.vmem [resolvable:$true] %s16_s10  ;;  %s619_s12 = int_to_ptr.vmem [resolvable:$true] %s25_s12 }
   0x4   :  { %s524_s15 = scalar_lea.hbm %s799_s0, 32 }
   0x5   :  { %p525_p0 = scmp.ne.s32.totalorder %s799_s0, %s524_s15  ;;  %p528_p1 = scmp.lt.u32.totalorder %s524_s15, %s799_s0 }
   0x7   :  { %p530_p2 = pnand %p528_p1, %p525_p0 }
   0x9   :  { %533 = shalt.err (!%p530_p2)
}
   0xa   :  { %s534_s20 = scalar_lea.vmem %s17_s10, 32  ;;  %p539_p4 = scmp.lt.s32.totalorder %s17_s10, %s17_s10 }
   0xb   :  { %p535_p3 = scmp.ne.s32.totalorder %s17_s10, %s534_s20  ;;  %p540_p5 = scmp.lt.s32.totalorder %s534_s20, %s534_s20 }
   0xd   :  { %p541_p6 = por %p540_p5, %p539_p4 }
   0xf   :  { %p542_p7 = pnand %p541_p6, %p535_p3 }
  0x11   :  { %545 = shalt.err (!%p542_p7)
}
  0x12   :  { %19 = dma.hbm_to_vmem [thread:$0]  %s799_s0, 32, %s17_s10, [#allocation3]  }
  0x13   :  { %s546_s25 = scalar_lea.hbm %s800_s1, 1024 }
  0x14   :  { %p547_p8 = scmp.ne.s32.totalorder %s800_s1, %s546_s25  ;;  %p550_p9 = scmp.lt.u32.totalorder %s546_s25, %s800_s1 }
  0x16   :  { %p552_p10 = pnand %p550_p9, %p547_p8 }
  0x18   :  { %555 = shalt.err (!%p552_p10)
}
  0x19   :  { %s556_s30 = scalar_lea.vmem %s619_s12, 1024  ;;  %p561_p12 = scmp.lt.s32.totalorder %s619_s12, %s619_s12 }
  0x1a   :  { %p557_p11 = scmp.ne.s32.totalorder %s619_s12, %s556_s30  ;;  %p562_p13 = scmp.lt.s32.totalorder %s556_s30, %s556_s30 }
  0x1c   :  { %p563_p0 = por %p562_p13, %p561_p12 }
  0x1e   :  { %p564_p1 = pnand %p563_p0, %p557_p11 }
  0x20   :  { %567 = shalt.err (!%p564_p1)
}
  0x21   :  { %s598_s0 = smov 256   ;;  %s599_s3 = smov 16  }
  0x22   :  { %31 = dma.hbm_to_vmem [thread:$0]  %s800_s1, 1024, %s619_s12, [#allocation6], %s598_s0, %s598_s0, %s599_s3  }
  0x23   :  { %590 = dma.done.wait [#allocation3], 32  }
  0x24   :  { %591 = vsyncadd [#allocation3], 4294967264 }
  0x25   :  { %592 = dma.done.wait [#allocation6], 1024  }
  0x26   :  { %593 = vsyncadd [#allocation6], 4294966272  ;;  %v44_v0 = vlaneseq  ;;  %v38_v2 = vld [vmem:[#allocation2] sm:$0x3]  ;;  %v246_v4 = vld [vmem:[#allocation5 + $0x8] sm:$0xff]  ;;  %s601_s1 = smov [#allocation7]  }
  0x27   :  { %vm39_vm0 = vcmp.gt.s32.totalorder %v38_v2, 0  ;;  %v250_v5 = vld [vmem:[#allocation5 + $0x28] sm:$0xff]  ;;  %317 = vmatprep.mubr.f32.mxu0 %v246_v4  ;;  %v600_v18 = vmov 1.0|1.0   ;;  %v245_v44 = vld [vmem:[#allocation5] sm:$0xff]  ;;  %v248_v46 = vld [vmem:[#allocation5 + $0x18] sm:$0xff] }
  0x28   :  { %v650_v1 = vshrl.u32 %v44_v0, 7  ;;  %v40_v6 = vsel %vm39_vm0, %v38_v2, 0  ;;  %327 = vmatprep.mubr.f32.mxu1 %v250_v5  ;;  %v249_v45 = vld [vmem:[#allocation5 + $0x20] sm:$0xff]  ;;  %v252_v47 = vld [vmem:[#allocation5 + $0x38] sm:$0xff]  ;;  %v247_v48 = vld [vmem:[#allocation5 + $0x10] sm:$0xff]  ;;  %s347_s6 = sshll.u32 %s601_s1, 4  ;;  %s348_s6 = int_to_ptr.vmem [resolvable:$true] %s347_s6 }
  0x29   :  { %vm41_vm1 = vcmp.lt.s32.totalorder %v40_v6, 16  ;;  %v251_v49 = vld [vmem:[#allocation5 + $0x30] sm:$0xff]  ;;  %s568_s7 = scalar_lea.vmem %s348_s6, 512  ;;  %p573_p3 = scmp.lt.s32.totalorder %s348_s6, %s348_s6 }
  0x2a   :  { %v79_v3 = vsub.s32 0, %v650_v1  ;;  %v115_v7 = vsub.s32 1, %v650_v1  ;;  %v61_v8 = vadd.s32 128, %v650_v1  ;;  %v42_v9 = vsel %vm41_vm1, %v40_v6, 16  ;;  %p569_p2 = scmp.ne.s32.totalorder %s348_s6, %s568_s7  ;;  %p574_p4 = scmp.lt.s32.totalorder %s568_s7, %s568_s7 }
  0x2b   :  { %v62_v10 = vadd.s32 136, %v650_v1  ;;  %v43_v11 = vadd.s32 128, %v42_v9  ;;  %v46_v14 = vadd.s32 8, %v650_v1  ;;  %v63_v15 = vadd.s32 144, %v650_v1 }
  0x2c   :  { %v656_v12 = vrot.slane %v42_v9, %v79_v3  ;;  %v64_v16 = vadd.s32 152, %v650_v1  ;;  %v47_v17 = vadd.s32 16, %v650_v1  ;;  %v48_v19 = vadd.s32 24, %v650_v1  ;;  %p575_p5 = por %p574_p4, %p573_p3 }
  0x2d   :  { %v658_v13 = vrot.slane %v43_v11, %v115_v7  ;;  %v65_v20 = vadd.s32 160, %v650_v1  ;;  %v66_v21 = vadd.s32 168, %v650_v1  ;;  %v49_v22 = vadd.s32 32, %v650_v1 }
  0x2e   :  { %vm97_vm2 = vcmp.eq.s32.totalorder %v61_v8, %v656_v12  ;;  %vm98_vm3 = vcmp.eq.s32.totalorder %v62_v10, %v656_v12  ;;  %vm81_vm7 = vcmp.eq.s32.totalorder %v650_v1, %v656_v12  ;;  %vm82_vm10 = vcmp.eq.s32.totalorder %v46_v14, %v656_v12  ;;  %p576_p6 = pnand %p575_p5, %p569_p2 }
  0x2f   :  { %vm133_vm4 = vcmp.eq.s32.totalorder %v61_v8, %v658_v13  ;;  %vm134_vm5 = vcmp.eq.s32.totalorder %v62_v10, %v658_v13  ;;  %vm117_vm8 = vcmp.eq.s32.totalorder %v650_v1, %v658_v13  ;;  %vm118_vm11 = vcmp.eq.s32.totalorder %v46_v14, %v658_v13 }
  0x30   :  { %vm165_vm6 = vmor %vm97_vm2, %vm133_vm4  ;;  %vm99_vm14 = vcmp.eq.s32.totalorder %v63_v15, %v656_v12  ;;  %vm135_vm15 = vcmp.eq.s32.totalorder %v63_v15, %v658_v13  ;;  %vm100_vm1 = vcmp.eq.s32.totalorder %v64_v16, %v656_v12  ;;  %vm136_vm2 = vcmp.eq.s32.totalorder %v64_v16, %v658_v13 }
  0x31   :  { %vm166_vm9 = vmor %vm98_vm3, %vm134_vm5  ;;  %vm83_vm5 = vcmp.eq.s32.totalorder %v47_v17, %v656_v12  ;;  %v50_v23 = vadd.s32 40, %v650_v1  ;;  %v67_v24 = vadd.s32 176, %v650_v1  ;;  %v68_v25 = vadd.s32 184, %v650_v1 }
  0x32   :  { %vm468_vm12 = vmpackc.low %vm166_vm9, %vm165_vm6  ;;  %vm119_vm6 = vcmp.eq.s32.totalorder %v47_v17, %v658_v13  ;;  %vm120_vm9 = vcmp.eq.s32.totalorder %v48_v19, %v658_v13  ;;  %v51_v26 = vadd.s32 48, %v650_v1  ;;  %v52_v27 = vadd.s32 56, %v650_v1 }
  0x33   :  { %469 = vmatprep.subr.msk.bf16.mxu0 %vm468_vm12, %v600_v18  ;;  %500 = vmatprep.subr.msk.bf16.mxu1 %vm468_vm12, %v600_v18  ;;  %vm149_vm13 = vmor %vm81_vm7, %vm117_vm8  ;;  %vm84_vm8 = vcmp.eq.s32.totalorder %v48_v19, %v656_v12  ;;  %vm101_vm12 = vcmp.eq.s32.totalorder %v65_v20, %v656_v12  ;;  %v69_v28 = vadd.s32 192, %v650_v1  ;;  %v70_v29 = vadd.s32 200, %v650_v1 }
  0x34   :  { %vm150_vm0 = vmor %vm82_vm10, %vm118_vm11  ;;  %v53_v30 = vadd.s32 64, %v650_v1  ;;  %v54_v31 = vadd.s32 72, %v650_v1  ;;  %v71_v32 = vadd.s32 208, %v650_v1  ;;  %v72_v33 = vadd.s32 216, %v650_v1 }
  0x35   :  { %vm470_vm3 = vmpackc.low %vm150_vm0, %vm149_vm13  ;;  %vm137_vm13 = vcmp.eq.s32.totalorder %v65_v20, %v658_v13  ;;  %vm138_vm0 = vcmp.eq.s32.totalorder %v66_v21, %v658_v13  ;;  %v55_v34 = vadd.s32 80, %v650_v1  ;;  %v56_v35 = vadd.s32 88, %v650_v1 }
  0x36   :  { %471 = vmatpush3.bf16.msk.msra.mxu0 %vm470_vm3, %v600_v18  ;;  %508 = vmatpush3.bf16.msk.msra.mxu1 %vm470_vm3, %v600_v18  ;;  %vm167_vm4 = vmor %vm99_vm14, %vm135_vm15  ;;  %vm102_vm15 = vcmp.eq.s32.totalorder %v66_v21, %v656_v12  ;;  %vm85_vm3 = vcmp.eq.s32.totalorder %v49_v22, %v656_v12  ;;  %v73_v36 = vadd.s32 224, %v650_v1  ;;  %v74_v37 = vadd.s32 232, %v650_v1 }
  0x37   :  { %vm168_vm7 = vmor %vm100_vm1, %vm136_vm2  ;;  %v57_v38 = vadd.s32 96, %v650_v1  ;;  %v58_v39 = vadd.s32 104, %v650_v1  ;;  %v75_v40 = vadd.s32 240, %v650_v1  ;;  %v76_v41 = vadd.s32 248, %v650_v1 }
  0x38   :  { %vm472_vm10 = vmpackc.low %vm168_vm7, %vm167_vm4  ;;  %vm121_vm4 = vcmp.eq.s32.totalorder %v49_v22, %v658_v13  ;;  %vm122_vm7 = vcmp.eq.s32.totalorder %v50_v23, %v658_v13  ;;  %v59_v42 = vadd.s32 112, %v650_v1  ;;  %v60_v43 = vadd.s32 120, %v650_v1 }
  0x39   :  { %473 = vmatprep.subr.msk.bf16.mxu0 %vm472_vm10, %v600_v18  ;;  %501 = vmatprep.subr.msk.bf16.mxu1 %vm472_vm10, %v600_v18  ;;  %vm151_vm11 = vmor %vm83_vm5, %vm119_vm6  ;;  %vm86_vm6 = vcmp.eq.s32.totalorder %v50_v23, %v656_v12  ;;  %vm103_vm10 = vcmp.eq.s32.totalorder %v67_v24, %v656_v12 }
  0x3a   :  { %vm152_vm14 = vmor %vm84_vm8, %vm120_vm9 }
  0x3b   :  { %vm474_vm1 = vmpackc.low %vm152_vm14, %vm151_vm11  ;;  %vm139_vm11 = vcmp.eq.s32.totalorder %v67_v24, %v658_v13  ;;  %vm140_vm14 = vcmp.eq.s32.totalorder %v68_v25, %v658_v13 }
  0x3c   :  { %475 = vmatpush3.bf16.msk.msra.mxu0 %vm474_vm1, %v600_v18  ;;  %509 = vmatpush3.bf16.msk.msra.mxu1 %vm474_vm1, %v600_v18  ;;  %vm169_vm2 = vmor %vm101_vm12, %vm137_vm13  ;;  %vm104_vm13 = vcmp.eq.s32.totalorder %v68_v25, %v656_v12  ;;  %vm87_vm1 = vcmp.eq.s32.totalorder %v51_v26, %v656_v12 }
  0x3d   :  { %vm170_vm5 = vmor %vm102_vm15, %vm138_vm0 }
  0x3e   :  { %vm476_vm8 = vmpackc.low %vm170_vm5, %vm169_vm2  ;;  %vm123_vm2 = vcmp.eq.s32.totalorder %v51_v26, %v658_v13  ;;  %vm124_vm5 = vcmp.eq.s32.totalorder %v52_v27, %v658_v13 }
  0x3f   :  { %477 = vmatprep.subr.msk.bf16.mxu0 %vm476_vm8, %v600_v18  ;;  %502 = vmatprep.subr.msk.bf16.mxu1 %vm476_vm8, %v600_v18  ;;  %vm153_vm9 = vmor %vm85_vm3, %vm121_vm4  ;;  %vm88_vm4 = vcmp.eq.s32.totalorder %v52_v27, %v656_v12  ;;  %vm105_vm8 = vcmp.eq.s32.totalorder %v69_v28, %v656_v12 }
  0x40   :  { %vm154_vm12 = vmor %vm86_vm6, %vm122_vm7 }
  0x41   :  { %vm478_vm15 = vmpackc.low %vm154_vm12, %vm153_vm9  ;;  %vm141_vm9 = vcmp.eq.s32.totalorder %v69_v28, %v658_v13  ;;  %vm142_vm12 = vcmp.eq.s32.totalorder %v70_v29, %v658_v13 }
  0x42   :  { %479 = vmatpush3.bf16.msk.msra.mxu0 %vm478_vm15, %v600_v18  ;;  %510 = vmatpush3.bf16.msk.msra.mxu1 %vm478_vm15, %v600_v18  ;;  %vm171_vm0 = vmor %vm103_vm10, %vm139_vm11  ;;  %vm106_vm11 = vcmp.eq.s32.totalorder %v70_v29, %v656_v12  ;;  %vm89_vm15 = vcmp.eq.s32.totalorder %v53_v30, %v656_v12 }
  0x43   :  { %vm172_vm3 = vmor %vm104_vm13, %vm140_vm14 }
  0x44   :  { %vm480_vm6 = vmpackc.low %vm172_vm3, %vm171_vm0  ;;  %vm125_vm0 = vcmp.eq.s32.totalorder %v53_v30, %v658_v13  ;;  %vm126_vm3 = vcmp.eq.s32.totalorder %v54_v31, %v658_v13 }
  0x45   :  { %481 = vmatprep.subr.msk.bf16.mxu0 %vm480_vm6, %v600_v18  ;;  %503 = vmatprep.subr.msk.bf16.mxu1 %vm480_vm6, %v600_v18  ;;  %vm155_vm7 = vmor %vm87_vm1, %vm123_vm2  ;;  %vm90_vm2 = vcmp.eq.s32.totalorder %v54_v31, %v656_v12  ;;  %vm107_vm6 = vcmp.eq.s32.totalorder %v71_v32, %v656_v12 }
  0x46   :  { %vm156_vm10 = vmor %vm88_vm4, %vm124_vm5 }
  0x47   :  { %vm482_vm13 = vmpackc.low %vm156_vm10, %vm155_vm7  ;;  %vm143_vm7 = vcmp.eq.s32.totalorder %v71_v32, %v658_v13  ;;  %vm144_vm10 = vcmp.eq.s32.totalorder %v72_v33, %v658_v13 }
  0x48   :  { %483 = vmatpush3.bf16.msk.msra.mxu0 %vm482_vm13, %v600_v18  ;;  %511 = vmatpush3.bf16.msk.msra.mxu1 %vm482_vm13, %v600_v18  ;;  %vm173_vm14 = vmor %vm105_vm8, %vm141_vm9  ;;  %vm108_vm9 = vcmp.eq.s32.totalorder %v72_v33, %v656_v12  ;;  %vm91_vm13 = vcmp.eq.s32.totalorder %v55_v34, %v656_v12 }
  0x49   :  { %vm174_vm1 = vmor %vm106_vm11, %vm142_vm12 }
  0x4a   :  { %vm484_vm4 = vmpackc.low %vm174_vm1, %vm173_vm14  ;;  %vm127_vm14 = vcmp.eq.s32.totalorder %v55_v34, %v658_v13  ;;  %vm128_vm1 = vcmp.eq.s32.totalorder %v56_v35, %v658_v13 }
  0x4b   :  { %485 = vmatprep.subr.msk.bf16.mxu0 %vm484_vm4, %v600_v18  ;;  %504 = vmatprep.subr.msk.bf16.mxu1 %vm484_vm4, %v600_v18  ;;  %vm157_vm5 = vmor %vm89_vm15, %vm125_vm0  ;;  %vm92_vm0 = vcmp.eq.s32.totalorder %v56_v35, %v656_v12  ;;  %vm109_vm4 = vcmp.eq.s32.totalorder %v73_v36, %v656_v12 }
  0x4c   :  { %vm158_vm8 = vmor %vm90_vm2, %vm126_vm3 }
  0x4d   :  { %vm486_vm11 = vmpackc.low %vm158_vm8, %vm157_vm5  ;;  %vm145_vm5 = vcmp.eq.s32.totalorder %v73_v36, %v658_v13  ;;  %vm146_vm8 = vcmp.eq.s32.totalorder %v74_v37, %v658_v13 }
  0x4e   :  { %487 = vmatpush3.bf16.msk.msra.mxu0 %vm486_vm11, %v600_v18  ;;  %512 = vmatpush3.bf16.msk.msra.mxu1 %vm486_vm11, %v600_v18  ;;  %vm175_vm12 = vmor %vm107_vm6, %vm143_vm7  ;;  %vm110_vm7 = vcmp.eq.s32.totalorder %v74_v37, %v656_v12  ;;  %vm93_vm11 = vcmp.eq.s32.totalorder %v57_v38, %v656_v12 }
  0x4f   :  { %vm176_vm15 = vmor %vm108_vm9, %vm144_vm10 }
  0x50   :  { %vm488_vm2 = vmpackc.low %vm176_vm15, %vm175_vm12  ;;  %vm129_vm12 = vcmp.eq.s32.totalorder %v57_v38, %v658_v13  ;;  %vm130_vm15 = vcmp.eq.s32.totalorder %v58_v39, %v658_v13 }
  0x51   :  { %489 = vmatprep.subr.msk.bf16.mxu0 %vm488_vm2, %v600_v18  ;;  %505 = vmatprep.subr.msk.bf16.mxu1 %vm488_vm2, %v600_v18  ;;  %vm159_vm3 = vmor %vm91_vm13, %vm127_vm14  ;;  %vm94_vm14 = vcmp.eq.s32.totalorder %v58_v39, %v656_v12  ;;  %vm111_vm2 = vcmp.eq.s32.totalorder %v75_v40, %v656_v12 }
  0x52   :  { %vm160_vm6 = vmor %vm92_vm0, %vm128_vm1 }
  0x53   :  { %vm490_vm9 = vmpackc.low %vm160_vm6, %vm159_vm3  ;;  %vm147_vm3 = vcmp.eq.s32.totalorder %v75_v40, %v658_v13  ;;  %vm148_vm6 = vcmp.eq.s32.totalorder %v76_v41, %v658_v13 }
  0x54   :  { %491 = vmatpush3.bf16.msk.msra.mxu0 %vm490_vm9, %v600_v18  ;;  %513 = vmatpush3.bf16.msk.msra.mxu1 %vm490_vm9, %v600_v18  ;;  %vm177_vm10 = vmor %vm109_vm4, %vm145_vm5  ;;  %vm112_vm5 = vcmp.eq.s32.totalorder %v76_v41, %v656_v12  ;;  %vm95_vm9 = vcmp.eq.s32.totalorder %v59_v42, %v656_v12 }
  0x55   :  { %vm178_vm13 = vmor %vm110_vm7, %vm146_vm8 }
  0x56   :  { %vm492_vm0 = vmpackc.low %vm178_vm13, %vm177_vm10  ;;  %vm131_vm10 = vcmp.eq.s32.totalorder %v59_v42, %v658_v13  ;;  %vm132_vm13 = vcmp.eq.s32.totalorder %v60_v43, %v658_v13 }
  0x57   :  { %493 = vmatprep.subr.msk.bf16.mxu0 %vm492_vm0, %v600_v18  ;;  %506 = vmatprep.subr.msk.bf16.mxu1 %vm492_vm0, %v600_v18  ;;  %vm161_vm1 = vmor %vm93_vm11, %vm129_vm12  ;;  %vm96_vm12 = vcmp.eq.s32.totalorder %v60_v43, %v656_v12 }
  0x58   :  { %vm162_vm4 = vmor %vm94_vm14, %vm130_vm15 }
  0x59   :  { %vm494_vm7 = vmpackc.low %vm162_vm4, %vm161_vm1 }
  0x5a   :  { %495 = vmatpush3.bf16.msk.msra.mxu0 %vm494_vm7, %v600_v18  ;;  %514 = vmatpush3.bf16.msk.msra.mxu1 %vm494_vm7, %v600_v18  ;;  %vm179_vm8 = vmor %vm111_vm2, %vm147_vm3 }
  0x5b   :  { %vm180_vm11 = vmor %vm112_vm5, %vm148_vm6 }
  0x5c   :  { %vm496_vm14 = vmpackc.low %vm180_vm11, %vm179_vm8 }
  0x5d   :  { %497 = vmatprep.subr.msk.bf16.mxu0 %vm496_vm14, %v600_v18  ;;  %507 = vmatprep.subr.msk.bf16.mxu1 %vm496_vm14, %v600_v18  ;;  %vm163_vm15 = vmor %vm95_vm9, %vm131_vm10 }
  0x5e   :  { %vm164_vm0 = vmor %vm96_vm12, %vm132_vm13 }
  0x5f   :  { %vm498_vm1 = vmpackc.low %vm164_vm0, %vm163_vm15 }
  0x60   :  { %499 = vmatpush3.bf16.msk.msra.mxu0 %vm498_vm1, %v600_v18  ;;  %515 = vmatpush3.bf16.msk.msra.mxu1 %vm498_vm1, %v600_v18 }
  0x63   :  { %318 = vmatmul.mubr.f32.vlgmr.msra.gmra.mrb[0].mxu0 %v245_v44  ;;  %328 = vmatmul.mubr.f32.vlgmr.msra.gmra.mrb[0].mxu1 %v249_v45 }
  0x64   :  { %322 = vmatprep.mubr.f32.mxu0 %v248_v46  ;;  %332 = vmatprep.mubr.f32.mxu1 %v252_v47 }
  0x67   :  { %323 = vmatmul.mubr.f32.gmra.mrb[2].mxu0 %v247_v48  ;;  %333 = vmatmul.mubr.f32.gmra.mrb[2].mxu1 %v251_v49 }
 0x136   :  { %v456_v50 = vpop.f32.mrb[0].mxu0  ;;  %v462_v51 = vpop.f32.mrb[0].mxu1 }
 0x137   :  { %v457_v52 = vpop.f32.mrb[1].mxu0  ;;  %v463_v53 = vpop.f32.mrb[1].mxu1 }
 0x138   :  { %v458_v54 = vadd.f32 %v457_v52, %v456_v50  ;;  %v464_v55 = vadd.f32 %v463_v53, %v462_v51 }
 0x13a   :  { %338 = vst [vmem:[#allocation7] sm:$0xff] %v458_v54  ;;  %340 = vst [vmem:[#allocation7 + $0x10] sm:$0xff] %v464_v55  ;;  %v459_v56 = vpop.f32.mrb[2].mxu0  ;;  %v465_v57 = vpop.f32.mrb[2].mxu1 }
 0x13b   :  { %v460_v58 = vpop.f32.mrb[3].mxu0  ;;  %v466_v59 = vpop.f32.mrb[3].mxu1 }
 0x13c   :  { %v461_v60 = vadd.f32 %v460_v58, %v459_v56  ;;  %v467_v61 = vadd.f32 %v466_v59, %v465_v57 }
 0x13e   :  { %339 = vst [vmem:[#allocation7 + $0x8] sm:$0xff] %v461_v60  ;;  %341 = vst [vmem:[#allocation7 + $0x18] sm:$0xff] %v467_v61 }
 0x13f   :  { %579 = shalt.err (!%p576_p6)
}
 0x140   :  { %s580_s10 = scalar_lea.hbm %s801_s2, 512 }
 0x141   :  { %p581_p7 = scmp.ne.s32.totalorder %s801_s2, %s580_s10  ;;  %p584_p8 = scmp.lt.u32.totalorder %s580_s10, %s801_s2 }
 0x143   :  { %p586_p9 = pnand %p584_p8, %p581_p7 }
 0x145   :  { %589 = shalt.err (!%p586_p9)
}
 0x146   :  { %s602_s15 = smov 128   ;;  %s603_s16 = smov 8  }
 0x147   :  { %353 = dma.vmem_to_hbm [thread:$0]  %s348_s6, 512, %s801_s2, [#allocation4], %s602_s15, %s602_s15, %s603_s16  }
 0x148   :  { %594 = dma.done.wait [#allocation4], 512  }
 0x149   :  { %595 = vsyncadd [#allocation4], 4294966784 }
 0x14a   :  { %357 = vsyncpa [#allocation3], 1 }
 0x14b   :  { %358 = vsyncpa [#allocation6], 1 }
 0x14c   :  { %359 = vsyncpa [#allocation4], 1 }

</bundles_post_ra>
